<compile_context>
chip_gen: v5e
topology: v5e:2x2
jax: 0.10.0
libtpu: 0.0.40
codegen_flags: <defaults>
</compile_context>

<pallas_src>
import functools
import math

import jax
import jax.numpy as jnp
from jax.experimental import pallas as pl
from jax.experimental.pallas import tpu as pltpu


def _round_up(x: int, m: int) -> int:
    return (x + m - 1) // m * m


def _divisor_tile(dim: int, target: int) -> int:
    """Largest multiple-of-128 tile <= target that divides dim (dim % 128 == 0)."""
    t = min(target, dim)
    while dim % t:
        t -= 128
    return t


def _choose_agg_tiles(n: int):
    """(n_pad, tm, tk) for the A-contraction grid.

    Mid/large branches keep n_pad // tm even (>= 2) so the 'parallel' row axis
    splits across both v7x TensorCores; small graphs fit in a single tile.
    """
    if n <= 512:
        n_pad = _round_up(n, 128)
        return n_pad, min(128, n_pad), n_pad          # single reduction step
    if n <= 4096:
        n_pad = _round_up(n, 1024)
        return n_pad, 512, 512                        # n_pad//tm even
    n_pad = _round_up(n, 2048)
    return n_pad, 1024, 512                           # n_pad//tm even


def _pad2(x, rows: int, cols: int):
    return jnp.pad(x, ((0, rows - x.shape[0]), (0, cols - x.shape[1])))


_COMPILER_PARAMS = pltpu.CompilerParams(
    dimension_semantics=("parallel", "arbitrary"),
    # Explicit budget: safe on v5e (16 MiB default scoped), v6e (32 MiB) and
    # v7x (64 MiB physical).  Per-step footprint after the support-first
    # restructure is < 4 MiB even at tm = 1024.
    vmem_limit_bytes=32 * 1024 * 1024,
)


# --------------------------------------------------------------------------
# Kernel 1: support = F @ W   (bf16 x bf16 -> f32 acc -> bf16 out)
# --------------------------------------------------------------------------
def _support_kernel(f_ref, w_ref, out_ref, acc_ref):
    k = pl.program_id(1)

    @pl.when(k == 0)
    def _init():
        acc_ref[...] = jnp.zeros_like(acc_ref)

    acc_ref[...] += jnp.dot(f_ref[...], w_ref[...],
                            preferred_element_type=jnp.float32)

    @pl.when(k == pl.num_programs(1) - 1)
    def _finalize():
        out_ref[...] = acc_ref[...].astype(out_ref.dtype)


def _support(f_bf16, w_bf16):
    n_pad, f_dim = f_bf16.shape
    o_dim = w_bf16.shape[1]
    tr = _divisor_tile(n_pad, 512)
    tf = _divisor_tile(f_dim, 512)
    grid = (n_pad // tr, f_dim // tf)

    return pl.pallas_call(
        _support_kernel,
        out_shape=jax.ShapeDtypeStruct((n_pad, o_dim), jnp.bfloat16),
        grid_spec=pltpu.PrefetchScalarGridSpec(
            num_scalar_prefetch=0,
            grid=grid,
            in_specs=[
                pl.BlockSpec((tr, tf), lambda i, k: (i, k)),      # node features
                pl.BlockSpec((tf, o_dim), lambda i, k: (k, 0)),   # weight slab
            ],
            out_specs=pl.BlockSpec((tr, o_dim), lambda i, k: (i, 0)),
            scratch_shapes=[pltpu.VMEM((tr, o_dim), jnp.float32)],
        ),
        compiler_params=_COMPILER_PARAMS,
    )(f_bf16, w_bf16)


# --------------------------------------------------------------------------
# Kernel 2: out[i,:] = act( sum_k A[i,k] @ S[k,:] + b )
# --------------------------------------------------------------------------
def _aggregate_kernel(a_ref, s_ref, b_ref, out_ref, acc_ref, *, apply_relu):
    k = pl.program_id(1)

    @pl.when(k == 0)
    def _init():
        acc_ref[...] = jnp.zeros_like(acc_ref)

    # Streaming A (bf16) @ support (bf16) -> small f32 accumulator on the MXU.
    acc_ref[...] += jnp.dot(a_ref[...], s_ref[...],
                            preferred_element_type=jnp.float32)

    @pl.when(k == pl.num_programs(1) - 1)
    def _finalize():
        z = acc_ref[...] + b_ref[...]
        if apply_relu:
            z = jnp.maximum(z, 0.0)
        out_ref[...] = z.astype(out_ref.dtype)


def _aggregate(a_bf16, s_bf16, b_f32, *, apply_relu, out_dtype, tm, tk):
    n_pad = a_bf16.shape[0]
    o_dim = s_bf16.shape[1]        # padded output dim (multiple of 128, lane-dense)
    grid = (n_pad // tm, n_pad // tk)

    return pl.pallas_call(
        functools.partial(_aggregate_kernel, apply_relu=apply_relu),
        out_shape=jax.ShapeDtypeStruct((n_pad, o_dim), out_dtype),
        grid_spec=pltpu.PrefetchScalarGridSpec(
            num_scalar_prefetch=0,
            grid=grid,
            in_specs=[
                # A tile: streamed over both grid axes (read exactly once).
                pl.BlockSpec((tm, tk), lambda i, k: (i, k)),
                # support tile: narrow (tk, o_dim) stream, re-read per row tile.
                pl.BlockSpec((tk, o_dim), lambda i, k: (k, 0)),
                # Bias row: resident.
                pl.BlockSpec((1, o_dim), lambda i, k: (0, 0)),
            ],
            out_specs=pl.BlockSpec((tm, o_dim), lambda i, k: (i, 0)),
            scratch_shapes=[pltpu.VMEM((tm, o_dim), jnp.float32)],
        ),
        compiler_params=_COMPILER_PARAMS,
    )(a_bf16, s_bf16, b_f32)


# --------------------------------------------------------------------------
# Full forward pass
# --------------------------------------------------------------------------
def prepare_adjacency(A_norm):
    """Cast-then-pad the normalized adjacency once; reusable across forward calls.

    Invariant relied on by the kernels: padded rows AND columns of A are zero.
    Padded rows of the hidden activation H equal relu(b1) != 0, but A's zero
    padded columns guarantee they never contribute to valid outputs.
    """
    N = A_norm.shape[0]
    n_pad, tm, tk = _choose_agg_tiles(N)
    A_p = _pad2(A_norm.astype(jnp.bfloat16), n_pad, n_pad)
    return A_p, (n_pad, tm, tk)


def gcn_forward(X, A_norm, W1, b1, W2, b2, *, prepared_adj=None):
    N, in_dim = X.shape
    hidden_dim = W1.shape[1]
    out_dim = W2.shape[1]

    if prepared_adj is None:
        prepared_adj = prepare_adjacency(A_norm)
    A_p, (n_pad, tm, tk) = prepared_adj

    in_pad = _round_up(in_dim, 128)
    hid_pad = _round_up(hidden_dim, 128)
    out_pad = _round_up(out_dim, 128)

    # bf16 operands everywhere (cast BEFORE padding); f32 biases.
    X_p = _pad2(X.astype(jnp.bfloat16), n_pad, in_pad)
    W1_p = _pad2(W1.astype(jnp.bfloat16), in_pad, hid_pad)
    b1_p = _pad2(b1.reshape(1, -1).astype(jnp.float32), 1, hid_pad)
    W2_p = _pad2(W2.astype(jnp.bfloat16), hid_pad, out_pad)
    b2_p = _pad2(b2.reshape(1, -1).astype(jnp.float32), 1, out_pad)

    # Layer 1: S1 = X @ W1 ;  H = relu(A @ S1 + b1)
    S1 = _support(X_p, W1_p)                                   # (n_pad, hid_pad) bf16
    H = _aggregate(A_p, S1, b1_p, apply_relu=True,
                   out_dtype=jnp.bfloat16, tm=tm, tk=tk)
    # TODO(synk): F.dropout(p=0.5, training=True) would need pltpu.prng_*; identity in eval mode.

    # Layer 2: S2 = H @ W2 ;  logits = A @ S2 + b2
    S2 = _support(H, W2_p)                                     # (n_pad, out_pad) bf16
    logits = _aggregate(A_p, S2, b2_p, apply_relu=False,
                        out_dtype=jnp.float32, tm=tm, tk=tk)

    return logits[:N, :out_dim]


# --------------------------------------------------------------------------
# Parameter init (mirrors GraphConvolution.reset_parameters) & reference
# --------------------------------------------------------------------------
def init_gcn_params(key, in_dim, hidden_dim, out_dim):
    k1, k2, k3, k4 = jax.random.split(key, 4)
    stdv1 = 1.0 / math.sqrt(hidden_dim)
    stdv2 = 1.0 / math.sqrt(out_dim)
    W1 = jax.random.uniform(k1, (in_dim, hidden_dim), jnp.float32, -stdv1, stdv1)
    b1 = jax.random.uniform(k2, (hidden_dim,), jnp.float32, -stdv1, stdv1)
    W2 = jax.random.uniform(k3, (hidden_dim, out_dim), jnp.float32, -stdv2, stdv2)
    b2 = jax.random.uniform(k4, (out_dim,), jnp.float32, -stdv2, stdv2)
    return W1, b1, W2, b2


def reference_forward(X, A, W1, b1, W2, b2):
    h = jnp.maximum(A @ (X @ W1) + b1, 0.0)
    return A @ (h @ W2) + b2


if __name__ == "__main__":
    key = jax.random.PRNGKey(0)
    N, in_dim, hidden_dim, out_dim = 64, 16, 32, 8

    kx, ka, kp = jax.random.split(key, 3)
    X = jax.random.normal(kx, (N, in_dim), jnp.float32)

    # Dense symmetric normalized adjacency  Â = D^-1/2 (A+I) D^-1/2.
    A_raw = (jax.random.uniform(ka, (N, N)) < 0.1).astype(jnp.float32)
    A_raw = jnp.maximum(A_raw, A_raw.T) + jnp.eye(N, dtype=jnp.float32)
    deg = A_raw.sum(axis=1)
    d_inv_sqrt = 1.0 / jnp.sqrt(deg)
    A_norm = A_raw * d_inv_sqrt[:, None] * d_inv_sqrt[None, :]

    W1, b1, W2, b2 = init_gcn_params(kp, in_dim, hidden_dim, out_dim)

    logits = gcn_forward(X, A_norm, W1, b1, W2, b2)
    jax.block_until_ready(logits)

    ref = reference_forward(X, A_norm, W1, b1, W2, b2)
    assert logits.shape == (N, out_dim)
    # bf16 A / X / activations / weights -> loosened tolerance vs pure-f32 reference.
    assert jnp.allclose(logits, ref, atol=1e-1, rtol=5e-2), (
        float(jnp.max(jnp.abs(logits - ref))))

    print("KERNEL_OK")
</pallas_src>

<mosaic_0001>
module attributes {stable_mosaic.version = 11 : i64} {
  func.func @_support_kernel(%arg0: i32, %arg1: i32, %arg2: memref<128x128xbf16, #tpu.memory_space<vmem>>, %arg3: memref<128x128xbf16, #tpu.memory_space<vmem>>, %arg4: memref<128x128xbf16, #tpu.memory_space<vmem>>, %arg5: memref<128x128xf32, #tpu.memory_space<vmem>>) attributes {dimension_semantics = [#tpu.dimension_semantics<parallel>, #tpu.dimension_semantics<arbitrary>], iteration_bounds = array<i64: 1, 1>, scalar_prefetch = 0 : i64, scratch_operands = 1 : i64, tpu.core_type = #tpu.core_type<tc>, window_params = [{transform_indices = @transform_0, window_bounds = array<i64: 128, 128>}, {transform_indices = @transform_1, window_bounds = array<i64: 128, 128>}, {transform_indices = @transform_2, window_bounds = array<i64: 128, 128>}]} {
    %c0_i32 = arith.constant 0 : i32
    %0 = arith.cmpi eq, %arg1, %c0_i32 : i32
    %1 = arith.extui %0 : i1 to i32
    %c0_i32_0 = arith.constant 0 : i32
    %2 = arith.cmpi ne, %1, %c0_i32_0 : i32
    scf.if %2 {
      %cst_10 = arith.constant 0.000000e+00 : f32
      %12 = vector.broadcast %cst_10 : f32 to vector<128x128xf32>
      %c0_11 = arith.constant 0 : index
      %c0_12 = arith.constant 0 : index
      %13 = vector.load %arg5[%c0_11, %c0_12] : memref<128x128xf32, #tpu.memory_space<vmem>>, vector<128x128xf32>
      tpu.vector_store %arg5[%c0_11, %c0_12], %12 {strides = array<i32>} : memref<128x128xf32, #tpu.memory_space<vmem>>, vector<128x128xf32>,
    } else {
    }
    %c0 = arith.constant 0 : index
    %c0_1 = arith.constant 0 : index
    %3 = vector.load %arg5[%c0, %c0_1] : memref<128x128xf32, #tpu.memory_space<vmem>>, vector<128x128xf32>
    %c0_2 = arith.constant 0 : index
    %c0_3 = arith.constant 0 : index
    %4 = vector.load %arg2[%c0_2, %c0_3] : memref<128x128xbf16, #tpu.memory_space<vmem>>, vector<128x128xbf16>
    %c0_4 = arith.constant 0 : index
    %c0_5 = arith.constant 0 : index
    %5 = vector.load %arg3[%c0_4, %c0_5] : memref<128x128xbf16, #tpu.memory_space<vmem>>, vector<128x128xbf16>
    %cst = arith.constant dense<0.000000e+00> : vector<128x128xf32>
    %6 = tpu.matmul %4, %5, %cst {dimension_numbers = #tpu.dot_dimension_numbers<[1], [0], [0], [1], [0, 0, 1, 1], [], []>} : vector<128x128xbf16>, vector<128x128xbf16>, vector<128x128xf32> -> vector<128x128xf32>
    %7 = arith.addf %3, %6 : vector<128x128xf32>
    %c0_6 = arith.constant 0 : index
    %c0_7 = arith.constant 0 : index
    %8 = vector.load %arg5[%c0_6, %c0_7] : memref<128x128xf32, #tpu.memory_space<vmem>>, vector<128x128xf32>
    tpu.vector_store %arg5[%c0_6, %c0_7], %7 {strides = array<i32>} : memref<128x128xf32, #tpu.memory_space<vmem>>, vector<128x128xf32>,
    %c0_i32_8 = arith.constant 0 : i32
    %9 = arith.cmpi eq, %arg1, %c0_i32_8 : i32
    %10 = arith.extui %9 : i1 to i32
    %c0_i32_9 = arith.constant 0 : i32
    %11 = arith.cmpi ne, %10, %c0_i32_9 : i32
    scf.if %11 {
      %c0_10 = arith.constant 0 : index
      %c0_11 = arith.constant 0 : index
      %12 = vector.load %arg5[%c0_10, %c0_11] : memref<128x128xf32, #tpu.memory_space<vmem>>, vector<128x128xf32>
      %13 = arith.truncf %12 : vector<128x128xf32> to vector<128x128xbf16>
      %c0_12 = arith.constant 0 : index
      %c0_13 = arith.constant 0 : index
      %14 = vector.load %arg4[%c0_12, %c0_13] : memref<128x128xbf16, #tpu.memory_space<vmem>>, vector<128x128xbf16>
      tpu.vector_store %arg4[%c0_12, %c0_13], %13 {strides = array<i32>} : memref<128x128xbf16, #tpu.memory_space<vmem>>, vector<128x128xbf16>,
    } else {
    }
    return
  }
  func.func @transform_0(%arg0: i32, %arg1: i32) -> (i32, i32) {
    %c0_i32 = arith.constant 0 : i32
    return %arg0, %arg1 : i32, i32
  }
  func.func @transform_1(%arg0: i32, %arg1: i32) -> (i32, i32) {
    %c0_i32 = arith.constant 0 : i32
    %c0_i32_0 = arith.constant 0 : i32
    return %arg1, %c0_i32 : i32, i32
  }
  func.func @transform_2(%arg0: i32, %arg1: i32) -> (i32, i32) {
    %c0_i32 = arith.constant 0 : i32
    %c0_i32_0 = arith.constant 0 : i32
    return %arg0, %c0_i32 : i32, i32
  }
}

</mosaic_0001>

<bundles_post_ra>
// kernel: tpu_custom_call.1
= control target key start
LH: loop header
LB: loop body
LE: loop exit
PB: predicated region body
PF: predicated region fallthrough
CT: control target
= control target key end

     0   :  { %7 = vsyncpa [#allocation4], 0  ;;  %s632_s0 = inlined_call_operand.hbm [shape: bf16[128,128], index: 0, kind: input, shape index: {}]   ;;  %s633_s1 = inlined_call_operand.hbm [shape: bf16[128,128], index: 1, kind: input, shape index: {}]   ;;  %s634_s2 = inlined_call_operand.hbm [shape: bf16[128,128], index: 2, kind: output, shape index: {}]  }
   0x1   :  { %8 = vsyncpa [#allocation7], 0 }
   0x2   :  { %9 = vsyncpa [#allocation5], 0  ;;  %s14_s11 = sshll.u32 %s632_s0, 4  ;;  %s594_s12 = smov [#allocation3]   ;;  %s15_s11 = int_to_ptr.hbm [resolvable:$true] %s14_s11 }
   0x3   :  { %s16_s13 = sshll.u32 %s594_s12, 4  ;;  %s27_s16 = sshll.u32 %s633_s1, 4  ;;  %s17_s13 = int_to_ptr.vmem [resolvable:$true] %s16_s13  ;;  %s28_s16 = int_to_ptr.hbm [resolvable:$true] %s27_s16 }
   0x4   :  { %s595_s17 = smov 64   ;;  %s596_s18 = smov 4  }
   0x5   :  { %22 = dma.hbm_to_vmem [thread:$0]  %s15_s11, 1024, %s17_s13, [#allocation4], %s595_s17, %s595_s17, %s596_s18  }
   0x6   :  { %s597_s19 = smov [#allocation6]  }
   0x7   :  { %s29_s20 = sshll.u32 %s597_s19, 4  ;;  %s30_s20 = int_to_ptr.vmem [resolvable:$true] %s29_s20 }
   0x8   :  { %35 = dma.hbm_to_vmem [thread:$0]  %s28_s16, 1024, %s30_s20, [#allocation7], %s595_s17, %s595_s17, %s596_s18  }
   0x9   :  { %588 = dma.done.wait [#allocation4], 1024  }
   0xa   :  { %589 = vsyncadd [#allocation4], 4294966272 }
   0xb   :  { %590 = dma.done.wait [#allocation7], 1024  }
   0xc   :  { %591 = vsyncadd [#allocation7], 4294966272  ;;  %v439_v0 = vld [vmem:[#allocation6 + $0x38] sm:$0xff]  ;;  %v438_v1 = vld [vmem:[#allocation6 + $0x30] sm:$0xff]  ;;  %s598_s0 = smov [#allocation8]   ;;  %s346_s23 = sshll.u32 %s634_s2, 4  ;;  %s347_s23 = int_to_ptr.hbm [resolvable:$true] %s346_s23 }
   0xd   :  { %208 = vmatpush.bf16.msra.mxu0 %v439_v0  ;;  %487 = vmatpush.bf16.msra.mxu1 %v439_v0  ;;  %v437_v2 = vld [vmem:[#allocation6 + $0x28] sm:$0xff]  ;;  %v436_v3 = vld [vmem:[#allocation6 + $0x20] sm:$0xff]  ;;  %v435_v4 = vld [vmem:[#allocation6 + $0x18] sm:$0xff]  ;;  %s344_s1 = sshll.u32 %s598_s0, 4  ;;  %s345_s1 = int_to_ptr.vmem [resolvable:$true] %s344_s1 }
   0xe   :  { %488 = vmatpush.bf16.msra.mxu2 %v439_v0  ;;  %489 = vmatpush.bf16.msra.mxu3 %v439_v0  ;;  %v434_v5 = vld [vmem:[#allocation6 + $0x10] sm:$0xff]  ;;  %v433_v6 = vld [vmem:[#allocation6 + $0x8] sm:$0xff]  ;;  %v432_v7 = vld [vmem:[#allocation6] sm:$0xff] }
   0xf   :  { %v424_v8 = vld [vmem:[#allocation3] sm:$0xff]  ;;  %v426_v9 = vld [vmem:[#allocation3 + $0x10] sm:$0xff]  ;;  %v425_v12 = vld [vmem:[#allocation3 + $0x8] sm:$0xff] }
  0x10   :  { %v428_v10 = vld [vmem:[#allocation3 + $0x20] sm:$0xff]  ;;  %v430_v11 = vld [vmem:[#allocation3 + $0x30] sm:$0xff]  ;;  %v427_v13 = vld [vmem:[#allocation3 + $0x18] sm:$0xff] }
  0x11   :  { %209 = vmatpush.bf16.msra.mxu0 %v438_v1  ;;  %490 = vmatpush.bf16.msra.mxu1 %v438_v1  ;;  %v429_v14 = vld [vmem:[#allocation3 + $0x28] sm:$0xff]  ;;  %v431_v15 = vld [vmem:[#allocation3 + $0x38] sm:$0xff] }
  0x12   :  { %491 = vmatpush.bf16.msra.mxu2 %v438_v1  ;;  %492 = vmatpush.bf16.msra.mxu3 %v438_v1 }
  0x15   :  { %210 = vmatpush.bf16.msra.mxu0 %v437_v2  ;;  %493 = vmatpush.bf16.msra.mxu1 %v437_v2 }
  0x16   :  { %494 = vmatpush.bf16.msra.mxu2 %v437_v2  ;;  %495 = vmatpush.bf16.msra.mxu3 %v437_v2 }
  0x19   :  { %211 = vmatpush.bf16.msra.mxu0 %v436_v3  ;;  %496 = vmatpush.bf16.msra.mxu1 %v436_v3 }
  0x1a   :  { %497 = vmatpush.bf16.msra.mxu2 %v436_v3  ;;  %498 = vmatpush.bf16.msra.mxu3 %v436_v3 }
  0x1d   :  { %212 = vmatpush.bf16.msra.mxu0 %v435_v4  ;;  %499 = vmatpush.bf16.msra.mxu1 %v435_v4 }
  0x1e   :  { %500 = vmatpush.bf16.msra.mxu2 %v435_v4  ;;  %501 = vmatpush.bf16.msra.mxu3 %v435_v4 }
  0x21   :  { %213 = vmatpush.bf16.msra.mxu0 %v434_v5  ;;  %502 = vmatpush.bf16.msra.mxu1 %v434_v5 }
  0x22   :  { %503 = vmatpush.bf16.msra.mxu2 %v434_v5  ;;  %504 = vmatpush.bf16.msra.mxu3 %v434_v5 }
  0x25   :  { %214 = vmatpush.bf16.msra.mxu0 %v433_v6  ;;  %505 = vmatpush.bf16.msra.mxu1 %v433_v6 }
  0x26   :  { %506 = vmatpush.bf16.msra.mxu2 %v433_v6  ;;  %507 = vmatpush.bf16.msra.mxu3 %v433_v6 }
  0x29   :  { %215 = vmatpush.bf16.msra.mxu0 %v432_v7  ;;  %508 = vmatpush.bf16.msra.mxu1 %v432_v7 }
  0x2a   :  { %509 = vmatpush.bf16.msra.mxu2 %v432_v7  ;;  %510 = vmatpush.bf16.msra.mxu3 %v432_v7 }
  0x2c   :  { %216 = vmatmul.bf16.vlgmr.msra.gmra.mxu0 %v424_v8  ;;  %226 = vmatmul.bf16.vlgmr.msra.gmra.mxu1 %v426_v9 }
  0x2d   :  { %236 = vmatmul.bf16.vlgmr.msra.gmra.mxu2 %v428_v10  ;;  %246 = vmatmul.bf16.vlgmr.msra.gmra.mxu3 %v430_v11 }
  0x3c   :  { %221 = vmatmul.bf16.gmra.mxu0 %v425_v12  ;;  %231 = vmatmul.bf16.gmra.mxu1 %v427_v13 }
  0x3d   :  { %241 = vmatmul.bf16.gmra.mxu2 %v429_v14  ;;  %251 = vmatmul.bf16.gmra.mxu3 %v431_v15 }
  0xa9   :  { %v217_v16 = vpop.f32.mrf.mxu0  ;;  %v227_v17 = vpop.f32.mrf.mxu1 }
  0xb0   :  { %v237_v18 = vpop.f32.mrf.mxu2  ;;  %v247_v19 = vpop.f32.mrf.mxu3 }
  0xb1   :  { %v219_v20 = vpop.f32.mrf.mxu0  ;;  %v229_v21 = vpop.f32.mrf.mxu1 }
  0xb2   :  { %v443_v22 = vpack.c.bf16 %v219_v20, %v217_v16  ;;  %v453_v23 = vpack.c.bf16 %v229_v21, %v227_v17 }
  0xb4   :  { %444 = vst [vmem:[#allocation8] sm:$0xff] %v443_v22  }
  0xb5   :  { %481 = vst [vmem:[#allocation8 + $0x10] sm:$0xff] %v453_v23  }
  0xb8   :  { %v239_v24 = vpop.f32.mrf.mxu2  ;;  %v249_v25 = vpop.f32.mrf.mxu3 }
  0xb9   :  { %v463_v26 = vpack.c.bf16 %v239_v24, %v237_v18  ;;  %v473_v27 = vpack.c.bf16 %v249_v25, %v247_v19  ;;  %v222_v28 = vpop.f32.mrf.mxu0  ;;  %v232_v29 = vpop.f32.mrf.mxu1 }
  0xbb   :  { %483 = vst [vmem:[#allocation8 + $0x20] sm:$0xff] %v463_v26  }
  0xbc   :  { %485 = vst [vmem:[#allocation8 + $0x30] sm:$0xff] %v473_v27  }
  0xc0   :  { %v242_v30 = vpop.f32.mrf.mxu2  ;;  %v252_v31 = vpop.f32.mrf.mxu3 }
  0xc1   :  { %v224_v32 = vpop.f32.mrf.mxu0  ;;  %v234_v33 = vpop.f32.mrf.mxu1 }
  0xc2   :  { %v448_v34 = vpack.c.bf16 %v224_v32, %v222_v28  ;;  %v458_v35 = vpack.c.bf16 %v234_v33, %v232_v29 }
  0xc4   :  { %480 = vst [vmem:[#allocation8 + $0x8] sm:$0xff] %v448_v34  }
  0xc5   :  { %482 = vst [vmem:[#allocation8 + $0x18] sm:$0xff] %v458_v35  }
  0xc8   :  { %v244_v36 = vpop.f32.mrf.mxu2  ;;  %v254_v37 = vpop.f32.mrf.mxu3 }
  0xc9   :  { %v468_v38 = vpack.c.bf16 %v244_v36, %v242_v30  ;;  %v478_v39 = vpack.c.bf16 %v254_v37, %v252_v31 }
  0xcb   :  { %484 = vst [vmem:[#allocation8 + $0x28] sm:$0xff] %v468_v38  }
  0xcc   :  { %486 = vst [vmem:[#allocation8 + $0x38] sm:$0xff] %v478_v39  }
  0xcd   :  { %352 = dma.vmem_to_hbm [thread:$0]  %s345_s1, 1024, %s347_s23, [#allocation5], %s595_s17, %s595_s17, %s596_s18  }
  0xce   :  { %592 = dma.done.wait [#allocation5], 1024  }
  0xcf   :  { %593 = vsyncadd [#allocation5], 4294966272 }
  0xd0   :  { %357 = vsyncpa [#allocation4], 1 }
  0xd1   :  { %358 = vsyncpa [#allocation7], 1 }
  0xd2   :  { %359 = vsyncpa [#allocation5], 1 }

</bundles_post_ra>
